<compile_context>
chip_gen: v7x
topology: tpu7x:2x2x1
jax: 0.10.0
libtpu: 0.0.40
codegen_flags: <defaults>
</compile_context>

<pallas_src>
import jax
import jax.numpy as jnp
from jax.experimental import pallas as pl
from jax.experimental.pallas import tpu as pltpu


def _value_net_kernel(x_ref, w1_ref, b1_ref, w2_ref, b2_ref, out_ref):
    # fc1 on the MXU: cast the streamed x tile to the MXU dtype (bf16 by
    # default) right before the matmul; accumulate in f32.
    x = x_ref[...].astype(w1_ref.dtype)                       # (TB, S)
    h = jnp.dot(x, w1_ref[...], preferred_element_type=jnp.float32)  # (TB, H) f32
    h = jnp.maximum(h + b1_ref[...], 0.0)                     # bias + ReLU, f32

    # fc2 in full f32 on the VPU (+ one lane reduce on the XLU):
    #   v[r] = sum_h h[r, h] * w2[h]
    # No N=1 MXU matmul, no transpose/relayout of h.
    v = jnp.sum(h * w2_ref[...], axis=-1, keepdims=True)      # (TB, 1) f32
    out_ref[...] = (v + b2_ref[0]).astype(out_ref.dtype)      # b2 is an SMEM scalar


def _round_up(n, m):
    return ((n + m - 1) // m) * m


def _vmem_limits():
    """Generation-aware (vmem_limit_bytes, tiling budget)."""
    cap = None
    try:
        info = pltpu.get_tpu_info()
        cap = getattr(info, "vmem_capacity_bytes", None)
    except Exception:
        cap = None
    if not cap:
        cap = 64 * 1024 * 1024          # conservative fallback: v7x physical VMEM
    # ~48 MiB on v7x (64 MiB physical), ~96 MiB on v5e/v6e (128 MiB physical).
    limit = min((cap * 3) // 4, 100 * 1024 * 1024)
    budget = int(limit * 0.85)          # headroom for Mosaic internal scratch
    return int(limit), budget


def _pick_block_batch(batch, state_dim, hidden, x_itemsize, w_itemsize, vmem_budget):
    """Pick the batch tile size.

    Accounts for: 128-lane padding of every VMEM block, double-buffered x and
    out tiles, the resident (double-buffered) w1/b1/w2, the in-kernel bf16 copy
    of the x tile, and the (tb, H) f32 intermediate h."""
    S_pad = _round_up(max(state_dim, 1), 128)
    H_pad = _round_up(max(hidden, 1), 128)
    S_sub = _round_up(max(state_dim, 1), 8)

    # Resident operands (constant index_map); charged at Pallas' default 2
    # buffers even though their block index never changes.
    resident = 2 * (S_sub * H_pad * w_itemsize     # w1 (S, H) in MXU dtype
                    + 8 * H_pad * 4                # b1 (1, H) f32
                    + 8 * H_pad * 4)               # w2 (1, H) f32

    # Per-row VMEM cost of one batch tile.
    per_row = (2 * S_pad * x_itemsize   # x tile, double buffered
               + 2 * 128 * 4            # out (tb, 1) f32 tile (lane-padded to 128), x2
               + S_pad * w_itemsize     # in-kernel bf16 copy of the x tile
               + 2 * H_pad * 4)         # h (f32) + headroom for elementwise temps

    avail = max(vmem_budget - resident, 512 * 1024)
    tb_vmem = max(128, ((avail // per_row) // 128) * 128)

    # Target ~4 MiB per (lane-padded) x buffer so the fixed per-step overhead is
    # amortized; cap at 8192 rows.
    tb_target = (4 * 1024 * 1024) // max(S_pad * x_itemsize, 1)
    tb_target = max(128, min(8192, (tb_target // 128) * 128))

    tb = min(tb_vmem, tb_target, _round_up(max(batch, 1), 128))

    # v7x has 2 TensorCores: when batch allows it, guarantee >= 2 tiles on the
    # "parallel" batch axis (harmless on single-core v5e/v6e).
    if batch > 128:
        tb = min(tb, _round_up(pl.cdiv(batch, 2), 128))
    return max(tb, 128)


def value_network_forward(x, w1, b1, w2, b2, *, mxu_dtype=jnp.bfloat16):
    """Pallas forward pass for ValueNetwork.

    x  : (state_dim,) or (batch, ...) -- flattened to (batch, state_dim)
    w1 : (state_dim, hidden), b1 : (hidden,)   (weights stored (in, out))
    w2 : (hidden, 1),         b2 : (1,)
    mxu_dtype : dtype used for the fc1 MXU operands (bf16 default, f32 for an
                exact-precision path).  Accumulation is always f32.
    returns: (batch,) float32 values
    """
    if x.ndim == 1:
        x = x[None, :]
    batch = x.shape[0]
    x = x.reshape(batch, -1)            # flatten; metadata-only for row-major x
    state_dim = x.shape[1]
    hidden = w1.shape[1]

    vmem_limit, vmem_budget = _vmem_limits()
    tb = _pick_block_batch(batch, state_dim, hidden,
                           jnp.dtype(x.dtype).itemsize,
                           jnp.dtype(mxu_dtype).itemsize,
                           vmem_budget)
    num_tiles = pl.cdiv(batch, tb)      # partial last tile handled by Pallas masking

    # Weights/biases are tiny (KB-scale): casting/reshaping them in the wrapper
    # is a one-time negligible cost.  x is NOT touched in the wrapper.
    w1_c = w1.astype(mxu_dtype)                          # (S, H), MXU dtype
    b1_c = b1.reshape(1, hidden).astype(jnp.float32)     # (1, H), f32
    w2_c = w2.reshape(1, hidden).astype(jnp.float32)     # (1, H) row, f32 (VPU fc2)
    b2_c = b2.reshape(1).astype(jnp.float32)             # SMEM scalar

    out = pl.pallas_call(
        _value_net_kernel,
        out_shape=jax.ShapeDtypeStruct((batch, 1), jnp.float32),
        grid_spec=pltpu.PrefetchScalarGridSpec(
            num_scalar_prefetch=0,
            grid=(num_tiles,),
            in_specs=[
                pl.BlockSpec((tb, state_dim), lambda i: (i, 0)),       # x tile (streamed)
                pl.BlockSpec((state_dim, hidden), lambda i: (0, 0)),   # w1 (resident)
                pl.BlockSpec((1, hidden), lambda i: (0, 0)),           # b1 (resident)
                pl.BlockSpec((1, hidden), lambda i: (0, 0)),           # w2 row (resident)
                pl.BlockSpec(memory_space=pltpu.MemorySpace.SMEM),     # b2 scalar
            ],
            out_specs=pl.BlockSpec((tb, 1), lambda i: (i, 0)),
        ),
        compiler_params=pltpu.CompilerParams(
            dimension_semantics=("parallel",),
            vmem_limit_bytes=vmem_limit,
        ),
    )(x, w1_c, b1_c, w2_c, b2_c)

    return out.reshape(batch)           # squeeze(-1): (batch,)


def init_params(key, state_dim, hidden_size):
    """Deterministic init mimicking nn.Linear's uniform(-1/sqrt(fan_in), 1/sqrt(fan_in))."""
    k1, k2, k3, k4 = jax.random.split(key, 4)
    bound1 = 1.0 / jnp.sqrt(state_dim)
    bound2 = 1.0 / jnp.sqrt(hidden_size)
    w1 = jax.random.uniform(k1, (state_dim, hidden_size), jnp.float32, -bound1, bound1)
    b1 = jax.random.uniform(k2, (hidden_size,), jnp.float32, -bound1, bound1)
    w2 = jax.random.uniform(k3, (hidden_size, 1), jnp.float32, -bound2, bound2)
    b2 = jax.random.uniform(k4, (1,), jnp.float32, -bound2, bound2)
    return w1, b1, w2, b2


if __name__ == "__main__":
    key = jax.random.PRNGKey(0)
    k_x, k_p, k_x2 = jax.random.split(key, 3)

    batch = 2
    state_dim = 4      # e.g. CartPole-like Box observation of shape (4,)
    hidden_size = 32

    x = jax.random.normal(k_x, (batch, state_dim), dtype=jnp.float32)
    w1, b1, w2, b2 = init_params(k_p, state_dim, hidden_size)

    def ref_forward(xx):
        xx = xx.reshape(xx.shape[0], -1)
        return (jnp.maximum(xx @ w1 + b1, 0.0) @ w2 + b2)[:, 0]

    # Exact-precision path (MXU operands kept in f32): tight tolerance.
    v_f32 = jax.block_until_ready(
        value_network_forward(x, w1, b1, w2, b2, mxu_dtype=jnp.float32))
    assert v_f32.shape == (batch,)
    assert jnp.allclose(v_f32, ref_forward(x), atol=1e-4, rtol=1e-4)

    # Default fast path: bf16 MXU operands for fc1, f32 accumulation, f32 fc2.
    v_bf16 = jax.block_until_ready(value_network_forward(x, w1, b1, w2, b2))
    assert v_bf16.shape == (batch,)
    assert jnp.allclose(v_bf16, ref_forward(x), atol=5e-2, rtol=5e-2)

    # Single-state (1-D) input path, as in the PyTorch module.
    v1 = jax.block_until_ready(
        value_network_forward(x[0], w1, b1, w2, b2, mxu_dtype=jnp.float32))
    assert v1.shape == (1,)
    assert jnp.allclose(v1, ref_forward(x)[:1], atol=1e-4, rtol=1e-4)

    # Multi-tile grid with a masked partial last tile (no wrapper-side padding).
    batch2 = 300
    x2 = jax.random.normal(k_x2, (batch2, state_dim), dtype=jnp.float32)
    v2 = jax.block_until_ready(
        value_network_forward(x2, w1, b1, w2, b2, mxu_dtype=jnp.float32))
    assert v2.shape == (batch2,)
    assert jnp.allclose(v2, ref_forward(x2), atol=1e-4, rtol=1e-4)

    print("KERNEL_OK")
</pallas_src>

<mosaic_0001>
module attributes {stable_mosaic.version = 11 : i64} {
  func.func @_value_net_kernel(%arg0: i32, %arg1: memref<128x4xf32, #tpu.memory_space<vmem>>, %arg2: memref<4x32xf32, #tpu.memory_space<vmem>>, %arg3: memref<1x32xf32, #tpu.memory_space<vmem>>, %arg4: memref<1x32xf32, #tpu.memory_space<vmem>>, %arg5: memref<1xf32, #tpu.memory_space<smem>>, %arg6: memref<128x1xf32, #tpu.memory_space<vmem>>) attributes {dimension_semantics = [#tpu.dimension_semantics<parallel>], iteration_bounds = array<i64: 1>, scalar_prefetch = 0 : i64, scratch_operands = 0 : i64, tpu.core_type = #tpu.core_type<tc>, window_params = [{transform_indices = @transform_0, window_bounds = array<i64: 128, 4>}, {pipeline_mode = #tpu.pipeline_mode<synchronous>, transform_indices = @transform_1, window_bounds = array<i64: 4, 32>}, {pipeline_mode = #tpu.pipeline_mode<synchronous>, transform_indices = @transform_2, window_bounds = array<i64: 1, 32>}, {pipeline_mode = #tpu.pipeline_mode<synchronous>, transform_indices = @transform_3, window_bounds = array<i64: 1, 32>}, {transform_indices = @transform_4, window_bounds = array<i64: 1>}, {transform_indices = @transform_5, window_bounds = array<i64: 128, 1>}]} {
    %c0 = arith.constant 0 : index
    %c0_0 = arith.constant 0 : index
    %0 = vector.load %arg1[%c0, %c0_0] : memref<128x4xf32, #tpu.memory_space<vmem>>, vector<128x4xf32>
    %c0_1 = arith.constant 0 : index
    %c0_2 = arith.constant 0 : index
    %1 = vector.load %arg2[%c0_1, %c0_2] : memref<4x32xf32, #tpu.memory_space<vmem>>, vector<4x32xf32>
    %cst = arith.constant dense<0.000000e+00> : vector<128x32xf32>
    %2 = tpu.matmul %0, %1, %cst {dimension_numbers = #tpu.dot_dimension_numbers<[1], [0], [0], [1], [0, 0, 1, 1], [], []>} : vector<128x4xf32>, vector<4x32xf32>, vector<128x32xf32> -> vector<128x32xf32>
    %c0_3 = arith.constant 0 : index
    %c0_4 = arith.constant 0 : index
    %3 = vector.load %arg3[%c0_3, %c0_4] : memref<1x32xf32, #tpu.memory_space<vmem>>, vector<1x32xf32>
    %4 = vector.broadcast %3 : vector<1x32xf32> to vector<128x32xf32>
    %5 = arith.addf %2, %4 : vector<128x32xf32>
    %cst_5 = arith.constant 0.000000e+00 : f32
    %6 = vector.broadcast %cst_5 : f32 to vector<128x32xf32>
    %7 = arith.maximumf %5, %6 : vector<128x32xf32>
    %c0_6 = arith.constant 0 : index
    %c0_7 = arith.constant 0 : index
    %8 = vector.load %arg4[%c0_6, %c0_7] : memref<1x32xf32, #tpu.memory_space<vmem>>, vector<1x32xf32>
    %9 = vector.broadcast %8 : vector<1x32xf32> to vector<128x32xf32>
    %10 = arith.mulf %7, %9 : vector<128x32xf32>
    %cst_8 = arith.constant dense<0.000000e+00> : vector<128xf32>
    %11 = vector.multi_reduction <add>, %10, %cst_8 [1] : vector<128x32xf32> to vector<128xf32>
    %12 = vector.shape_cast %11 : vector<128xf32> to vector<128x1xf32>
    %c0_9 = arith.constant 0 : index
    %13 = memref.load %arg5[%c0_9] : memref<1xf32, #tpu.memory_space<smem>>
    %14 = vector.broadcast %13 : f32 to vector<128x1xf32>
    %15 = arith.addf %12, %14 : vector<128x1xf32>
    %c0_10 = arith.constant 0 : index
    %c0_11 = arith.constant 0 : index
    %16 = vector.load %arg6[%c0_10, %c0_11] : memref<128x1xf32, #tpu.memory_space<vmem>>, vector<128x1xf32>
    tpu.vector_store %arg6[%c0_10, %c0_11], %15 {strides = array<i32>} : memref<128x1xf32, #tpu.memory_space<vmem>>, vector<128x1xf32>,
    return
  }
  func.func @transform_0(%arg0: i32) -> (i32, i32) {
    %c0_i32 = arith.constant 0 : i32
    %c0_i32_0 = arith.constant 0 : i32
    return %arg0, %c0_i32 : i32, i32
  }
  func.func @transform_1(%arg0: i32) -> (i32, i32) {
    %c0_i32 = arith.constant 0 : i32
    %c0_i32_0 = arith.constant 0 : i32
    %c0_i32_1 = arith.constant 0 : i32
    return %c0_i32, %c0_i32_0 : i32, i32
  }
  func.func @transform_2(%arg0: i32) -> (i32, i32) {
    %c0_i32 = arith.constant 0 : i32
    %c0_i32_0 = arith.constant 0 : i32
    %c0_i32_1 = arith.constant 0 : i32
    return %c0_i32, %c0_i32_0 : i32, i32
  }
  func.func @transform_3(%arg0: i32) -> (i32, i32) {
    %c0_i32 = arith.constant 0 : i32
    %c0_i32_0 = arith.constant 0 : i32
    %c0_i32_1 = arith.constant 0 : i32
    return %c0_i32, %c0_i32_0 : i32, i32
  }
  func.func @transform_4(%arg0: i32) -> i32 {
    %c0_i32 = arith.constant 0 : i32
    %c0_i32_0 = arith.constant 0 : i32
    return %c0_i32 : i32
  }
  func.func @transform_5(%arg0: i32) -> (i32, i32) {
    %c0_i32 = arith.constant 0 : i32
    %c0_i32_0 = arith.constant 0 : i32
    return %arg0, %c0_i32 : i32, i32
  }
}

</mosaic_0001>

<bundles_post_ra>
// kernel: tpu_custom_call.1
= control target key start
LH: loop header
LB: loop body
LE: loop exit
PB: predicated region body
PF: predicated region fallthrough
CT: control target
= control target key end

     0   :  { %vm94_vm0 = vcmask 1043456   ;;  %vm45_vm1 = vcmask 31744   ;;  %vm282_vm2 = vcmask 261120   ;;  %vm349_vm3 = vcmask 7168   ;;  %s630_s0 = inlined_call_operand.vmem [shape: f32[2,4], index: 0, kind: input, shape index: {}]   ;;  %s631_s1 = inlined_call_operand.vmem [shape: f32[4,32], index: 1, kind: input, shape index: {}]   ;;  %s632_s2 = inlined_call_operand.vmem [shape: f32[1,32], index: 2, kind: input, shape index: {}]   ;;  %s633_s3 = inlined_call_operand.vmem [shape: f32[1,32], index: 3, kind: input, shape index: {}]   ;;  %s634_s4 = inlined_call_operand.<no memory space> [shape: f32[1], index: 4, kind: input, shape index: {}]   ;;  %s635_s5 = inlined_call_operand.vmem [shape: f32[2,1], index: 5, kind: output, shape index: {}]  }
   0x1   :  { %v37_v0 = vld [vmem:[%s631_s1] sm:$0xf]  ;;  %v22_v3 = vld [vmem:[%s630_s0 + $0x8] sm:$0xff]  ;;  %v23_v5 = vld [vmem:[%s630_s0 + $0x10] sm:$0xff] }
   0x2   :  { %v21_v1 = vld [vmem:[%s630_s0] sm:$0xff]  ;;  %441 = vmatprep.subr.msk.mxu0 %vm94_vm0, %v37_v0  ;;  %467 = vmatprep.subr.msk.mxu1 %vm94_vm0, %v37_v0  ;;  %v30_v4 = vld [vmem:[%s630_s0 + $0x48] sm:$0xff]  ;;  %v31_v6 = vld [vmem:[%s630_s0 + $0x50] sm:$0xff] }
   0x3   :  { %v29_v2 = vld [vmem:[%s630_s0 + $0x40] sm:$0xff]  ;;  %442 = vmatpush3.msk.msra.mxu0 %vm94_vm0, %v37_v0  ;;  %468 = vmatpush3.msk.msra.mxu1 %vm94_vm0, %v37_v0  ;;  %v24_v7 = vld [vmem:[%s630_s0 + $0x18] sm:$0xff]  ;;  %v26_v11 = vld [vmem:[%s630_s0 + $0x28] sm:$0xff] }
   0x4   :  { %443 = vmatprep.mubr.msk.f32.mxu0 %vm45_vm1, %v21_v1  ;;  %455 = vmatprep.mubr.msk.f32.mxu1 %vm45_vm1, %v29_v2  ;;  %v32_v8 = vld [vmem:[%s630_s0 + $0x58] sm:$0xff]  ;;  %v25_v9 = vld [vmem:[%s630_s0 + $0x20] sm:$0xff]  ;;  %v34_v12 = vld [vmem:[%s630_s0 + $0x68] sm:$0xff] }
   0x5   :  { %444 = vmatmul.mubr.msk.f32.vlgmr.msra.gmra.mrb[0].mxu0 %vm45_vm1, %v22_v3  ;;  %456 = vmatmul.mubr.msk.f32.vlgmr.msra.gmra.mrb[0].mxu1 %vm45_vm1, %v30_v4  ;;  %v33_v10 = vld [vmem:[%s630_s0 + $0x60] sm:$0xff]  ;;  %v27_v13 = vld [vmem:[%s630_s0 + $0x30] sm:$0xff]  ;;  %v28_v15 = vld [vmem:[%s630_s0 + $0x38] sm:$0xff] }
   0x6   :  { %446 = vmatprep.mubr.msk.f32.mxu0 %vm45_vm1, %v23_v5  ;;  %458 = vmatprep.mubr.msk.f32.mxu1 %vm45_vm1, %v31_v6  ;;  %v35_v14 = vld [vmem:[%s630_s0 + $0x70] sm:$0xff]  ;;  %v36_v16 = vld [vmem:[%s630_s0 + $0x78] sm:$0xff]  ;;  %v569_v17 = vld [vmem:[%s632_s2] ss:$0 sm:$0xff] }
   0x7   :  { %v578_v26 = vld [vmem:[%s633_s3] ss:$0 sm:$0xff] }
   0x9   :  { %447 = vmatmul.mubr.msk.f32.gmra.mrb[2].mxu0 %vm45_vm1, %v24_v7  ;;  %459 = vmatmul.mubr.msk.f32.gmra.mrb[2].mxu1 %vm45_vm1, %v32_v8 }
   0xa   :  { %449 = vmatprep.mubr.msk.f32.mxu0 %vm45_vm1, %v25_v9  ;;  %461 = vmatprep.mubr.msk.f32.mxu1 %vm45_vm1, %v33_v10 }
   0xd   :  { %450 = vmatmul.mubr.msk.f32.gmra.mrb[4].mxu0 %vm45_vm1, %v26_v11  ;;  %462 = vmatmul.mubr.msk.f32.gmra.mrb[4].mxu1 %vm45_vm1, %v34_v12 }
   0xe   :  { %452 = vmatprep.mubr.msk.f32.mxu0 %vm45_vm1, %v27_v13  ;;  %464 = vmatprep.mubr.msk.f32.mxu1 %vm45_vm1, %v35_v14 }
  0x11   :  { %453 = vmatmul.mubr.msk.f32.gmra.mrb[6].mxu0 %vm45_vm1, %v28_v15  ;;  %465 = vmatmul.mubr.msk.f32.gmra.mrb[6].mxu1 %vm45_vm1, %v36_v16 }
  0xd8   :  { %v445_v18 = vpop.f32.mrb[0].mxu0  ;;  %v457_v19 = vpop.f32.mrb[0].mxu1 }
  0xd9   :  { %v170_v20 = vadd.f32 %v445_v18, %v569_v17  ;;  %v210_v21 = vadd.f32 %v457_v19, %v569_v17  ;;  %v164_v22 = vpop.f32.mrb[1].mxu0  ;;  %v204_v23 = vpop.f32.mrb[1].mxu1 }
  0xda   :  { %v165_v24 = vadd.f32 %v569_v17, %v164_v22  ;;  %v205_v25 = vadd.f32 %v569_v17, %v204_v23 }
  0xdb   :  { %v244_v27 = vmax.f32 %v170_v20, 0.0  ;;  %v252_v28 = vmax.f32 %v210_v21, 0.0 }
  0xdc   :  { %v243_v29 = vmax.f32 %v165_v24, 0.0  ;;  %v448_v30 = vpop.f32.mrb[2].mxu0  ;;  %v460_v31 = vpop.f32.mrb[2].mxu1  ;;  %v251_v38 = vmax.f32 %v205_v25, 0.0 }
  0xdd   :  { %v180_v32 = vadd.f32 %v448_v30, %v569_v17  ;;  %v174_v33 = vpop.f32.mrb[3].mxu0  ;;  %v220_v34 = vadd.f32 %v460_v31, %v569_v17  ;;  %v275_v35 = vmul.f32 %v578_v26, %v252_v28  ;;  %v214_v36 = vpop.f32.mrb[3].mxu1  ;;  %v267_v37 = vmul.f32 %v578_v26, %v244_v27 }
  0xde   :  { %v175_v39 = vadd.f32 %v569_v17, %v174_v33  ;;  %v215_v40 = vadd.f32 %v569_v17, %v214_v36  ;;  %v266_v41 = vmul.f32 %v578_v26, %v243_v29  ;;  %v274_v54 = vmul.f32 %v578_v26, %v251_v38 }
  0xdf   :  { %v246_v42 = vmax.f32 %v180_v32, 0.0  ;;  %v254_v43 = vmax.f32 %v220_v34, 0.0  ;;  %v310_v44 = vsel %vm282_vm2, %v275_v35, 0.0  ;;  %v286_v45 = vsel %vm282_vm2, %v267_v37, 0.0 }
  0xe0   :  { %311 = vadd.xlane.f32.xlu1 %v310_v44  ;;  %287 = vadd.xlane.f32.xlu0 %v286_v45  ;;  %v451_v46 = vpop.f32.mrb[4].mxu0  ;;  %v463_v47 = vpop.f32.mrb[4].mxu1  ;;  %v245_v55 = vmax.f32 %v175_v39, 0.0  ;;  %v253_v56 = vmax.f32 %v215_v40, 0.0  ;;  %v283_v58 = vsel %vm282_vm2, %v266_v41, 0.0  ;;  %v307_v4 = vsel %vm282_vm2, %v274_v54, 0.0 }
  0xe1   :  { %v269_v48 = vmul.f32 %v578_v26, %v246_v42  ;;  %v190_v49 = vadd.f32 %v451_v46, %v569_v17  ;;  %v184_v50 = vpop.f32.mrb[5].mxu0  ;;  %v277_v51 = vmul.f32 %v578_v26, %v254_v43  ;;  %v224_v52 = vpop.f32.mrb[5].mxu1  ;;  %v230_v59 = vadd.f32 %v463_v47, %v569_v17 }
  0xe2   :  { %v185_v53 = vadd.f32 %v569_v17, %v184_v50  ;;  %v225_v60 = vadd.f32 %v569_v17, %v224_v52  ;;  %v268_v5 = vmul.f32 %v578_v26, %v245_v55  ;;  %v276_v6 = vmul.f32 %v578_v26, %v253_v56 }
  0xe3   :  { %v292_v57 = vsel %vm282_vm2, %v269_v48, 0.0  ;;  %v248_v63 = vmax.f32 %v190_v49, 0.0  ;;  %v316_v1 = vsel %vm282_vm2, %v277_v51, 0.0  ;;  %v256_v7 = vmax.f32 %v230_v59, 0.0 }
  0xe4   :  { %293 = vadd.xlane.f32.xlu1 %v292_v57  ;;  %284 = vadd.xlane.f32.xlu0 %v283_v58  ;;  %v454_v61 = vpop.f32.mrb[6].mxu0  ;;  %v466_v62 = vpop.f32.mrb[6].mxu1  ;;  %v247_v0 = vmax.f32 %v185_v53, 0.0  ;;  %v255_v8 = vmax.f32 %v225_v60, 0.0  ;;  %v289_v13 = vsel %vm282_vm2, %v268_v5, 0.0  ;;  %v313_v14 = vsel %vm282_vm2, %v276_v6, 0.0 }
  0xe5   :  { %v194_v2 = vpop.f32.mrb[7].mxu0  ;;  %v234_v3 = vpop.f32.mrb[7].mxu1  ;;  %v200_v9 = vadd.f32 %v454_v61, %v569_v17  ;;  %v271_v11 = vmul.f32 %v578_v26, %v248_v63  ;;  %v240_v15 = vadd.f32 %v466_v62, %v569_v17  ;;  %v279_v18 = vmul.f32 %v578_v26, %v256_v7 }
  0xe6   :  { %v195_v10 = vadd.f32 %v569_v17, %v194_v2  ;;  %v270_v12 = vmul.f32 %v578_v26, %v247_v0  ;;  %v235_v16 = vadd.f32 %v569_v17, %v234_v3  ;;  %v278_v19 = vmul.f32 %v578_v26, %v255_v8 }
  0xe7   :  { %v250_v20 = vmax.f32 %v200_v9, 0.0  ;;  %v298_v22 = vsel %vm282_vm2, %v271_v11, 0.0  ;;  %v258_v24 = vmax.f32 %v240_v15, 0.0  ;;  %v322_v25 = vsel %vm282_vm2, %v279_v18, 0.0 }
  0xe8   :  { %317 = vadd.xlane.f32.xlu1 %v316_v1  ;;  %308 = vadd.xlane.f32.xlu0 %v307_v4  ;;  %v249_v21 = vmax.f32 %v195_v10, 0.0  ;;  %v295_v23 = vsel %vm282_vm2, %v270_v12, 0.0  ;;  %v257_v27 = vmax.f32 %v235_v16, 0.0  ;;  %v319_v28 = vsel %vm282_vm2, %v278_v19, 0.0 }
  0xe9   :  { %v273_v17 = vmul.f32 %v578_v26, %v250_v20  ;;  %v281_v32 = vmul.f32 %v578_v26, %v258_v24  ;;  %v332_v36 = vstv %s634_s4 }
  0xea   :  { %v272_v29 = vmul.f32 %v578_v26, %v249_v21  ;;  %v280_v33 = vmul.f32 %v578_v26, %v257_v27 }
  0xeb   :  { %v304_v30 = vsel %vm282_vm2, %v273_v17, 0.0  ;;  %v328_v34 = vsel %vm282_vm2, %v281_v32, 0.0 }
  0xec   :  { %290 = vadd.xlane.f32.xlu1 %v289_v13  ;;  %314 = vadd.xlane.f32.xlu0 %v313_v14  ;;  %v301_v31 = vsel %vm282_vm2, %v272_v29, 0.0  ;;  %v325_v35 = vsel %vm282_vm2, %v280_v33, 0.0 }
  0xf0   :  { %299 = vadd.xlane.f32.xlu1 %v298_v22  ;;  %296 = vadd.xlane.f32.xlu0 %v295_v23 }
  0xf4   :  { %323 = vadd.xlane.f32.xlu1 %v322_v25  ;;  %320 = vadd.xlane.f32.xlu0 %v319_v28 }
  0xf8   :  { %305 = vadd.xlane.f32.xlu1 %v304_v30  ;;  %302 = vadd.xlane.f32.xlu0 %v301_v31 }
  0xfc   :  { %329 = vadd.xlane.f32.xlu1 %v328_v34  ;;  %326 = vadd.xlane.f32.xlu0 %v325_v35 }
 0x16d   :  { %v312_v37 = vpop.xlane.xlu1 %311  ;;  %v288_v38 = vpop.xlane.xlu0 %287 }
 0x171   :  { %v294_v39 = vpop.xlane.xlu1 %293  ;;  %v285_v40 = vpop.xlane.xlu0 %284 }
 0x172   :  { %v333_v41 = vadd.f32 %v332_v36, %v285_v40 }
 0x174   :  { %350 = vst.msk [vmem:[#allocation3] sm:$0xff] %vm349_vm3, %v333_v41 }
 0x175   :  { %v318_v26 = vpop.xlane.xlu1 %317  ;;  %v309_v42 = vpop.xlane.xlu0 %308 }
 0x179   :  { %v291_v43 = vpop.xlane.xlu1 %290  ;;  %v315_v44 = vpop.xlane.xlu0 %314 }
 0x17b   :  { %v383_v45 = vld [vmem:[#allocation3] sm:$0x3] }
 0x17c   :  { %384 = vst [vmem:[%s635_s5] sm:$0x3] %v383_v45 }
 0x17d   :  { %v300_v46 = vpop.xlane.xlu1 %299  ;;  %v297_v47 = vpop.xlane.xlu0 %296 }
 0x181   :  { %v324_v48 = vpop.xlane.xlu1 %323  ;;  %v321_v49 = vpop.xlane.xlu0 %320 }
 0x185   :  { %v306_v50 = vpop.xlane.xlu1 %305  ;;  %v303_v51 = vpop.xlane.xlu0 %302 }
 0x189   :  { %v330_v52 = vpop.xlane.xlu1 %329  ;;  %v327_v53 = vpop.xlane.xlu0 %326 }

</bundles_post_ra>
